<compile_context>
chip_gen: v6e
topology: v6e:2x2x1
jax: 0.10.0
libtpu: 0.0.40
codegen_flags: <defaults>
</compile_context>

<pallas_src>
import functools

import jax
import jax.numpy as jnp
from jax.experimental import pallas as pl
from jax.experimental.pallas import tpu as pltpu

LN_EPS = 1e-5
_INV_SQRT2 = 0.7071067811865476        # 1/sqrt(2)
_SQRT_2_OVER_PI = 0.7978845608028654   # sqrt(2/pi), for tanh-approx GELU


def _round_up(x, m):
    return ((x + m - 1) // m) * m


def _vmem_limit_bytes():
    # Generation-aware VMEM budget: leave ~8 MiB headroom for internal scratch,
    # cap at 96 MiB (v5e/v6e have 128 MiB physical, v7x only 64 MiB -> ~56 MiB).
    # Fall back to a universally-safe 48 MiB if the query is unavailable.
    try:
        cap = pltpu.get_tpu_info().vmem_capacity_bytes
        return int(min(cap - 8 * 1024 * 1024, 96 * 1024 * 1024))
    except Exception:
        return 48 * 1024 * 1024


def _nlvr2_head_kernel(x_ref, w1_ref, b1_ref, gamma_ref, beta_ref,
                       w2_ref, b2_ref, o_ref, *, approximate_gelu):
    # --- dense: (TILE_B, 2H) @ (2H, H), native (bf16) MXU, f32 accumulation ---
    h = jnp.dot(x_ref[...], w1_ref[...], preferred_element_type=jnp.float32)
    h = h + b1_ref[...].astype(jnp.float32)

    # --- LayerNorm over last dim (f32 stats; reuse `centered` for variance) ---
    mean = jnp.mean(h, axis=-1, keepdims=True)
    centered = h - mean
    var = jnp.mean(centered * centered, axis=-1, keepdims=True)
    inv = jax.lax.rsqrt(var + LN_EPS)
    hn = centered * inv * gamma_ref[...].astype(jnp.float32) \
         + beta_ref[...].astype(jnp.float32)

    # --- GELU ---
    if approximate_gelu:
        # tanh formulation: transcendental goes to the EUP slot (frees VALU on
        # v6e/v7x); ~1e-3 deviation from torch's exact erf GELU.
        g = 0.5 * hn * (1.0 + jnp.tanh(
            _SQRT_2_OVER_PI * (hn + 0.044715 * hn * hn * hn)))
    else:
        # exact erf formulation (torch nn.GELU default)
        g = 0.5 * hn * (1.0 + jax.lax.erf(hn * _INV_SQRT2))

    # --- out_proj: (TILE_B, H) @ (H, L_pad) + (1, L_pad), lane-dense store ---
    out = jnp.dot(g.astype(w2_ref.dtype), w2_ref[...],
                  preferred_element_type=jnp.float32)
    out = out + b2_ref[...].astype(jnp.float32)
    o_ref[...] = out.astype(o_ref.dtype)


def nlvr2_classification_head(features, w1, b1, gamma, beta, w2, b2, *,
                              tile_b=None, compute_dtype=jnp.bfloat16,
                              approximate_gelu=False):
    """features: (B, 2H); w1: (2H, H); w2: (H, L); biases/affine as (1, dim)."""
    B, in_dim = features.shape
    H = w1.shape[1]
    L = w2.shape[1]
    out_dtype = features.dtype

    # bf16-native MXU path: cast activations + matmul weights to one compute
    # dtype (f32 accumulation happens inside the kernel).  Enforcing matching
    # dtypes here avoids silent promotion losing the bf16 MXU path.
    x = features.astype(compute_dtype)
    w1c = w1.astype(compute_dtype)
    w2c = w2.astype(compute_dtype)

    # Lane-dense output: pad the tiny num_labels dim up to a multiple of 128.
    L_pad = pl.cdiv(L, 128) * 128
    if L_pad != L:
        w2c = jnp.pad(w2c, ((0, 0), (0, L_pad - L)))
        b2p = jnp.pad(b2, ((0, 0), (0, L_pad - L)))
    else:
        b2p = b2

    # Batch tile: sublane-aligned and chosen so the grid has >=4 steps for
    # realistic batch sizes (DMA/compute overlap + 2-TC sharding on v7x),
    # capped at 256 rows so double-buffered tiles stay small.
    if tile_b is None:
        tile_b = min(256, _round_up(max(pl.cdiv(B, 4), 1), 8))
    tile_b = max(8, _round_up(tile_b, 8))
    B_pad = _round_up(B, tile_b)
    # NOTE: zero-padded batch rows hit LayerNorm with var=0 -> rsqrt(LN_EPS);
    # values stay finite and are sliced off below, so this is benign.
    if B_pad != B:
        x = jnp.pad(x, ((0, B_pad - B), (0, 0)))
    grid = (B_pad // tile_b,)

    itemsize = jnp.dtype(compute_dtype).itemsize
    cost = pl.CostEstimate(
        flops=2 * B_pad * (in_dim * H + H * L_pad),
        transcendentals=B_pad * H,
        bytes_accessed=(x.size * itemsize
                        + w1c.size * itemsize + w2c.size * itemsize
                        + b1.size * 4 + gamma.size * 4 + beta.size * 4
                        + b2p.size * 4
                        + B_pad * L_pad * jnp.dtype(out_dtype).itemsize),
    )

    kernel = functools.partial(_nlvr2_head_kernel,
                               approximate_gelu=approximate_gelu)

    out = pl.pallas_call(
        kernel,
        out_shape=jax.ShapeDtypeStruct((B_pad, L_pad), out_dtype),
        grid=grid,
        in_specs=[
            # activation tile: streamed / double-buffered over the batch grid
            pl.BlockSpec((tile_b, in_dim), lambda i: (i, 0)),
            # weights + affine params: fully resident across all grid steps
            pl.BlockSpec(w1c.shape, lambda i: (0, 0)),
            pl.BlockSpec(b1.shape, lambda i: (0, 0)),
            pl.BlockSpec(gamma.shape, lambda i: (0, 0)),
            pl.BlockSpec(beta.shape, lambda i: (0, 0)),
            pl.BlockSpec(w2c.shape, lambda i: (0, 0)),
            pl.BlockSpec(b2p.shape, lambda i: (0, 0)),
        ],
        out_specs=pl.BlockSpec((tile_b, L_pad), lambda i: (i, 0)),
        compiler_params=pltpu.CompilerParams(
            dimension_semantics=("parallel",),   # shard batch tiles across TCs (v7x)
            vmem_limit_bytes=_vmem_limit_bytes(),
        ),
        cost_estimate=cost,
    )(x, w1c, b1, gamma, beta, w2c, b2p)

    # TODO(synk): for very large hidden sizes on v7x (2H*H*itemsize approaching
    # ~half the 64 MiB VMEM), split the 2H contraction over a trailing
    # "arbitrary" grid axis with an f32 VMEM accumulator instead of keeping W1
    # fully resident.
    return out[:B, :L]


def _reference(features, w1, b1, gamma, beta, w2, b2, approximate=False):
    h = features @ w1 + b1
    mean = jnp.mean(h, axis=-1, keepdims=True)
    var = jnp.mean((h - mean) ** 2, axis=-1, keepdims=True)
    hn = (h - mean) / jnp.sqrt(var + LN_EPS) * gamma + beta
    if approximate:
        g = 0.5 * hn * (1.0 + jnp.tanh(
            _SQRT_2_OVER_PI * (hn + 0.044715 * hn ** 3)))
    else:
        g = 0.5 * hn * (1.0 + jax.lax.erf(hn / jnp.sqrt(2.0)))
    return g @ w2 + b2


if __name__ == "__main__":
    hidden = 32
    num_labels = 4

    key = jax.random.PRNGKey(0)
    k_x, k_w1, k_b1, k_w2, k_b2, k_x2 = jax.random.split(key, 6)

    # Parameters (shapes from module __init__), stored pre-transposed.
    w1 = jax.random.normal(k_w1, (2 * hidden, hidden), jnp.float32) * 0.05
    b1 = jax.random.normal(k_b1, (1, hidden), jnp.float32) * 0.05
    gamma = jnp.ones((1, hidden), jnp.float32)     # LayerNorm default init
    beta = jnp.zeros((1, hidden), jnp.float32)
    w2 = jax.random.normal(k_w2, (hidden, num_labels), jnp.float32) * 0.05
    b2 = jax.random.normal(k_b2, (1, num_labels), jnp.float32) * 0.05

    # --- case 1: f32 compute path, tiny batch (tight numerical check) ---
    batch = 2
    features = jax.random.normal(k_x, (batch, 2 * hidden), jnp.float32)
    out = nlvr2_classification_head(features, w1, b1, gamma, beta, w2, b2,
                                    compute_dtype=jnp.float32)
    out = jax.block_until_ready(out)
    ref = _reference(features, w1, b1, gamma, beta, w2, b2)
    assert out.shape == (batch, num_labels)
    assert jnp.allclose(out, ref, atol=1e-4, rtol=1e-4), \
        "mismatch vs reference (case 1, f32)"

    # --- case 2: default bf16 MXU path, multi-tile batch grid ---
    batch2 = 20
    features2 = jax.random.normal(k_x2, (batch2, 2 * hidden), jnp.float32)
    out2 = nlvr2_classification_head(features2, w1, b1, gamma, beta, w2, b2)
    out2 = jax.block_until_ready(out2)
    # reference on bf16-rounded matmul operands (the kernel's compute dtype)
    f2_bf = features2.astype(jnp.bfloat16).astype(jnp.float32)
    w1_bf = w1.astype(jnp.bfloat16).astype(jnp.float32)
    w2_bf = w2.astype(jnp.bfloat16).astype(jnp.float32)
    ref2 = _reference(f2_bf, w1_bf, b1, gamma, beta, w2_bf, b2)
    assert out2.shape == (batch2, num_labels)
    assert jnp.allclose(out2, ref2, atol=2e-2, rtol=2e-2), \
        "mismatch vs reference (case 2, bf16)"

    # --- case 3: tanh-approx GELU path (EUP offload variant) ---
    out3 = nlvr2_classification_head(features2, w1, b1, gamma, beta, w2, b2,
                                     approximate_gelu=True)
    out3 = jax.block_until_ready(out3)
    ref3 = _reference(f2_bf, w1_bf, b1, gamma, beta, w2_bf, b2,
                      approximate=True)
    assert out3.shape == (batch2, num_labels)
    assert jnp.allclose(out3, ref3, atol=2e-2, rtol=2e-2), \
        "mismatch vs reference (case 3, approx GELU)"

    print("KERNEL_OK")
</pallas_src>

<mosaic_0001>
module attributes {stable_mosaic.version = 11 : i64} {
  func.func @_nlvr2_head_kernel(%arg0: i32, %arg1: memref<8x64xf32, #tpu.memory_space<vmem>>, %arg2: memref<64x32xf32, #tpu.memory_space<vmem>>, %arg3: memref<1x32xf32, #tpu.memory_space<vmem>>, %arg4: memref<1x32xf32, #tpu.memory_space<vmem>>, %arg5: memref<1x32xf32, #tpu.memory_space<vmem>>, %arg6: memref<32x128xf32, #tpu.memory_space<vmem>>, %arg7: memref<1x128xf32, #tpu.memory_space<vmem>>, %arg8: memref<8x128xf32, #tpu.memory_space<vmem>>) attributes {dimension_semantics = [#tpu.dimension_semantics<parallel>], iteration_bounds = array<i64: 1>, scalar_prefetch = 0 : i64, scratch_operands = 0 : i64, tpu.core_type = #tpu.core_type<tc>, window_params = [{transform_indices = @transform_0, window_bounds = array<i64: 8, 64>}, {pipeline_mode = #tpu.pipeline_mode<synchronous>, transform_indices = @transform_1, window_bounds = array<i64: 64, 32>}, {pipeline_mode = #tpu.pipeline_mode<synchronous>, transform_indices = @transform_2, window_bounds = array<i64: 1, 32>}, {pipeline_mode = #tpu.pipeline_mode<synchronous>, transform_indices = @transform_3, window_bounds = array<i64: 1, 32>}, {pipeline_mode = #tpu.pipeline_mode<synchronous>, transform_indices = @transform_4, window_bounds = array<i64: 1, 32>}, {pipeline_mode = #tpu.pipeline_mode<synchronous>, transform_indices = @transform_5, window_bounds = array<i64: 32, 128>}, {pipeline_mode = #tpu.pipeline_mode<synchronous>, transform_indices = @transform_6, window_bounds = array<i64: 1, 128>}, {transform_indices = @transform_7, window_bounds = array<i64: 8, 128>}]} {
    %c0 = arith.constant 0 : index
    %c0_0 = arith.constant 0 : index
    %0 = vector.load %arg1[%c0, %c0_0] : memref<8x64xf32, #tpu.memory_space<vmem>>, vector<8x64xf32>
    %c0_1 = arith.constant 0 : index
    %c0_2 = arith.constant 0 : index
    %1 = vector.load %arg2[%c0_1, %c0_2] : memref<64x32xf32, #tpu.memory_space<vmem>>, vector<64x32xf32>
    %cst = arith.constant dense<0.000000e+00> : vector<8x32xf32>
    %2 = tpu.matmul %0, %1, %cst {dimension_numbers = #tpu.dot_dimension_numbers<[1], [0], [0], [1], [0, 0, 1, 1], [], []>} : vector<8x64xf32>, vector<64x32xf32>, vector<8x32xf32> -> vector<8x32xf32>
    %c0_3 = arith.constant 0 : index
    %c0_4 = arith.constant 0 : index
    %3 = vector.load %arg3[%c0_3, %c0_4] : memref<1x32xf32, #tpu.memory_space<vmem>>, vector<1x32xf32>
    %4 = vector.broadcast %3 : vector<1x32xf32> to vector<8x32xf32>
    %5 = arith.addf %2, %4 : vector<8x32xf32>
    %cst_5 = arith.constant dense<0.000000e+00> : vector<8xf32>
    %6 = vector.multi_reduction <add>, %5, %cst_5 [1] : vector<8x32xf32> to vector<8xf32>
    %7 = vector.shape_cast %6 : vector<8xf32> to vector<8x1xf32>
    %cst_6 = arith.constant 3.200000e+01 : f32
    %8 = vector.broadcast %cst_6 : f32 to vector<8x1xf32>
    %9 = arith.divf %7, %8 : vector<8x1xf32>
    %10 = vector.broadcast %9 : vector<8x1xf32> to vector<8x32xf32>
    %11 = arith.subf %5, %10 : vector<8x32xf32>
    %12 = arith.mulf %11, %11 : vector<8x32xf32>
    %cst_7 = arith.constant dense<0.000000e+00> : vector<8xf32>
    %13 = vector.multi_reduction <add>, %12, %cst_7 [1] : vector<8x32xf32> to vector<8xf32>
    %14 = vector.shape_cast %13 : vector<8xf32> to vector<8x1xf32>
    %cst_8 = arith.constant 3.200000e+01 : f32
    %15 = vector.broadcast %cst_8 : f32 to vector<8x1xf32>
    %16 = arith.divf %14, %15 : vector<8x1xf32>
    %cst_9 = arith.constant 9.99999974E-6 : f32
    %17 = vector.broadcast %cst_9 : f32 to vector<8x1xf32>
    %18 = arith.addf %16, %17 : vector<8x1xf32>
    %19 = math.rsqrt %18 : vector<8x1xf32>
    %20 = vector.broadcast %19 : vector<8x1xf32> to vector<8x32xf32>
    %21 = arith.mulf %11, %20 : vector<8x32xf32>
    %c0_10 = arith.constant 0 : index
    %c0_11 = arith.constant 0 : index
    %22 = vector.load %arg4[%c0_10, %c0_11] : memref<1x32xf32, #tpu.memory_space<vmem>>, vector<1x32xf32>
    %23 = vector.broadcast %22 : vector<1x32xf32> to vector<8x32xf32>
    %24 = arith.mulf %21, %23 : vector<8x32xf32>
    %c0_12 = arith.constant 0 : index
    %c0_13 = arith.constant 0 : index
    %25 = vector.load %arg5[%c0_12, %c0_13] : memref<1x32xf32, #tpu.memory_space<vmem>>, vector<1x32xf32>
    %26 = vector.broadcast %25 : vector<1x32xf32> to vector<8x32xf32>
    %27 = arith.addf %24, %26 : vector<8x32xf32>
    %cst_14 = arith.constant 5.000000e-01 : f32
    %28 = vector.broadcast %cst_14 : f32 to vector<8x32xf32>
    %29 = arith.mulf %28, %27 : vector<8x32xf32>
    %cst_15 = arith.constant 0.707106769 : f32
    %30 = vector.broadcast %cst_15 : f32 to vector<8x32xf32>
    %31 = arith.mulf %27, %30 : vector<8x32xf32>
    %32 = math.erf %31 : vector<8x32xf32>
    %cst_16 = arith.constant 1.000000e+00 : f32
    %33 = vector.broadcast %cst_16 : f32 to vector<8x32xf32>
    %34 = arith.addf %33, %32 : vector<8x32xf32>
    %35 = arith.mulf %29, %34 : vector<8x32xf32>
    %c0_17 = arith.constant 0 : index
    %c0_18 = arith.constant 0 : index
    %36 = vector.load %arg6[%c0_17, %c0_18] : memref<32x128xf32, #tpu.memory_space<vmem>>, vector<32x128xf32>
    %cst_19 = arith.constant dense<0.000000e+00> : vector<8x128xf32>
    %37 = tpu.matmul %35, %36, %cst_19 {dimension_numbers = #tpu.dot_dimension_numbers<[1], [0], [0], [1], [0, 0, 1, 1], [], []>} : vector<8x32xf32>, vector<32x128xf32>, vector<8x128xf32> -> vector<8x128xf32>
    %c0_20 = arith.constant 0 : index
    %c0_21 = arith.constant 0 : index
    %38 = vector.load %arg7[%c0_20, %c0_21] : memref<1x128xf32, #tpu.memory_space<vmem>>, vector<1x128xf32>
    %39 = vector.broadcast %38 : vector<1x128xf32> to vector<8x128xf32>
    %40 = arith.addf %37, %39 : vector<8x128xf32>
    %c0_22 = arith.constant 0 : index
    %c0_23 = arith.constant 0 : index
    %41 = vector.load %arg8[%c0_22, %c0_23] : memref<8x128xf32, #tpu.memory_space<vmem>>, vector<8x128xf32>
    tpu.vector_store %arg8[%c0_22, %c0_23], %40 {strides = array<i32>} : memref<8x128xf32, #tpu.memory_space<vmem>>, vector<8x128xf32>,
    return
  }
  func.func @transform_0(%arg0: i32) -> (i32, i32) {
    %c0_i32 = arith.constant 0 : i32
    %c0_i32_0 = arith.constant 0 : i32
    return %arg0, %c0_i32 : i32, i32
  }
  func.func @transform_1(%arg0: i32) -> (i32, i32) {
    %c0_i32 = arith.constant 0 : i32
    %c0_i32_0 = arith.constant 0 : i32
    %c0_i32_1 = arith.constant 0 : i32
    return %c0_i32, %c0_i32_0 : i32, i32
  }
  func.func @transform_2(%arg0: i32) -> (i32, i32) {
    %c0_i32 = arith.constant 0 : i32
    %c0_i32_0 = arith.constant 0 : i32
    %c0_i32_1 = arith.constant 0 : i32
    return %c0_i32, %c0_i32_0 : i32, i32
  }
  func.func @transform_3(%arg0: i32) -> (i32, i32) {
    %c0_i32 = arith.constant 0 : i32
    %c0_i32_0 = arith.constant 0 : i32
    %c0_i32_1 = arith.constant 0 : i32
    return %c0_i32, %c0_i32_0 : i32, i32
  }
  func.func @transform_4(%arg0: i32) -> (i32, i32) {
    %c0_i32 = arith.constant 0 : i32
    %c0_i32_0 = arith.constant 0 : i32
    %c0_i32_1 = arith.constant 0 : i32
    return %c0_i32, %c0_i32_0 : i32, i32
  }
  func.func @transform_5(%arg0: i32) -> (i32, i32) {
    %c0_i32 = arith.constant 0 : i32
    %c0_i32_0 = arith.constant 0 : i32
    %c0_i32_1 = arith.constant 0 : i32
    return %c0_i32, %c0_i32_0 : i32, i32
  }
  func.func @transform_6(%arg0: i32) -> (i32, i32) {
    %c0_i32 = arith.constant 0 : i32
    %c0_i32_0 = arith.constant 0 : i32
    %c0_i32_1 = arith.constant 0 : i32
    return %c0_i32, %c0_i32_0 : i32, i32
  }
  func.func @transform_7(%arg0: i32) -> (i32, i32) {
    %c0_i32 = arith.constant 0 : i32
    %c0_i32_0 = arith.constant 0 : i32
    return %arg0, %c0_i32 : i32, i32
  }
}

</mosaic_0001>

<bundles_post_ra>
// kernel: tpu_custom_call.1
= control target key start
LH: loop header
LB: loop body
LE: loop exit
PB: predicated region body
PF: predicated region fallthrough
CT: control target
= control target key end

     0   :  { %v331_v1 = vmov 0.0   ;;  %vm332_vm0 = vmmov 0   ;;  %s431_s0 = inlined_call_operand.vmem [shape: f32[8,64], index: 0, kind: input, shape index: {}]   ;;  %s432_s1 = inlined_call_operand.vmem [shape: f32[64,32], index: 1, kind: input, shape index: {}]   ;;  %s433_s2 = inlined_call_operand.vmem [shape: f32[1,32], index: 2, kind: input, shape index: {}]   ;;  %s434_s3 = inlined_call_operand.vmem [shape: f32[1,32], index: 3, kind: input, shape index: {}]   ;;  %s435_s4 = inlined_call_operand.vmem [shape: f32[1,32], index: 4, kind: input, shape index: {}]   ;;  %s436_s5 = inlined_call_operand.vmem [shape: f32[32,128], index: 5, kind: input, shape index: {}]   ;;  %s437_s6 = inlined_call_operand.vmem [shape: f32[1,128], index: 6, kind: input, shape index: {}]   ;;  %s438_s7 = inlined_call_operand.hbm [shape: f32[8,128], index: 7, kind: output, shape index: {}]  }
   0x1   :  { %v35_v0 = vld [vmem:[%s432_s1 + $0x38] sm:$0xff]  ;;  %272 = vmatprep.subr.mxu0 %v331_v1  ;;  %v34_v2 = vld [vmem:[%s432_s1 + $0x30] sm:$0xff]  ;;  %288 = vmatprep.mubr.msk.f32.mxu0 %vm332_vm0, %v331_v1  ;;  %v33_v3 = vld [vmem:[%s432_s1 + $0x28] sm:$0xff] }
   0x2   :  { %273 = vmatpush3.msra.mxu0 %v35_v0  ;;  %291 = vmatprep.subr.mxu1 %v331_v1 }
   0x3   :  { %274 = vmatprep.subr.mxu0 %v331_v1  ;;  %299 = vmatprep.mubr.msk.f32.mxu1 %vm332_vm0, %v331_v1 }
   0x4   :  { %12 = vsyncpa [#allocation3], 0  ;;  %275 = vmatpush3.msra.mxu0 %v34_v2  ;;  %v32_v4 = vld [vmem:[%s432_s1 + $0x20] sm:$0xff]  ;;  %v31_v5 = vld [vmem:[%s432_s1 + $0x18] sm:$0xff]  ;;  %vm43_vm1 = vcmask 523264   ;;  %vm117_vm2 = vcmask 261120  }
   0x5   :  { %276 = vmatprep.subr.mxu0 %v331_v1  ;;  %v30_v6 = vld [vmem:[%s432_s1 + $0x10] sm:$0xff]  ;;  %v29_v7 = vld [vmem:[%s432_s1 + $0x8] sm:$0xff]  ;;  %v28_v8 = vld [vmem:[%s432_s1] sm:$0xff] }
   0x6   :  { %277 = vmatpush3.msra.mxu0 %v33_v3  ;;  %v27_v9 = vld [vmem:[%s431_s0] sm:$0xff]  ;;  %v156_v20 = vld [vmem:[%s436_s5 + $0x18] sm:$0xff]  ;;  %v155_v21 = vld [vmem:[%s436_s5 + $0x10] sm:$0xff] }
   0x7   :  { %278 = vmatprep.subr.mxu0 %v331_v1  ;;  %v252_v10 = vld [vmem:[%s433_s2] ss:$0 sm:$0xff]  ;;  %292 = vmatpush3.msra.mxu1 %v156_v20  ;;  %v154_v22 = vld [vmem:[%s436_s5 + $0x8] sm:$0xff] }
   0x8   :  { %279 = vmatpush3.msra.mxu0 %v32_v4  ;;  %293 = vmatprep.subr.mxu1 %v331_v1  ;;  %v153_v23 = vld [vmem:[%s436_s5] sm:$0xff] }
   0x9   :  { %280 = vmatprep.subr.mxu0 %v331_v1  ;;  %294 = vmatpush3.msra.mxu1 %v155_v21  ;;  %v254_v28 = vld [vmem:[%s434_s3] ss:$0 sm:$0xff]  ;;  %s333_s3 = smov [#allocation2]  }
   0xa   :  { %281 = vmatpush3.msra.mxu0 %v31_v5  ;;  %295 = vmatprep.subr.mxu1 %v331_v1  ;;  %v255_v30 = vld [vmem:[%s435_s4] ss:$0 sm:$0xff]  ;;  %s244_s8 = sshll.u32 %s333_s3, 4  ;;  %s245_s8 = int_to_ptr.vmem [resolvable:$true] %s244_s8 }
   0xb   :  { %282 = vmatprep.subr.mxu0 %v331_v1  ;;  %296 = vmatpush3.msra.mxu1 %v154_v22  ;;  %v256_v38 = vld [vmem:[%s437_s6] ss:$0 sm:$0xff]  ;;  %s309_s4 = scalar_lea.vmem %s245_s8, 128  ;;  %p314_p1 = scmp.lt.s32.totalorder %s245_s8, %s245_s8 }
   0xc   :  { %283 = vmatpush3.msra.mxu0 %v30_v6  ;;  %297 = vmatprep.subr.mxu1 %v331_v1  ;;  %p310_p0 = scmp.ne.s32.totalorder %s245_s8, %s309_s4  ;;  %p315_p2 = scmp.lt.s32.totalorder %s309_s4, %s309_s4 }
   0xd   :  { %284 = vmatprep.subr.mxu0 %v331_v1  ;;  %298 = vmatpush3.msra.mxu1 %v153_v23 }
   0xe   :  { %285 = vmatpush3.msra.mxu0 %v29_v7  ;;  %p316_p3 = por %p315_p2, %p314_p1 }
   0xf   :  { %286 = vmatprep.subr.mxu0 %v331_v1 }
  0x10   :  { %287 = vmatpush3.msra.mxu0 %v28_v8  ;;  %p317_p4 = pnand %p316_p3, %p310_p0 }
  0x11   :  { %289 = vmatmul.mubr.msk.f32.vlgmr.msra.gmra.mxu0 %vm43_vm1, %v27_v9 }
  0xd1   :  { %v113_v11 = vpop.f32.mrf.mxu0 }
  0xd2   :  { %v114_v12 = vadd.f32 %v252_v10, %v113_v11 }
  0xd3   :  { %v290_v13 = vpop.f32.mrf.mxu0 }
  0xd4   :  { %v118_v14 = vsel %vm117_vm2, %v114_v12, 0.0 }
  0xd5   :  { %119 = vadd.xlane.f32.xlu0 %v118_v14 }
 0x15e   :  { %v120_v15 = vpop.xlane.xlu0 %119 }
 0x15f   :  { %v122_v16 = vmul.f32 0.03125, %v120_v15 }
 0x161   :  { %v123_v17 = vsub.f32 %v114_v12, %v122_v16 }
 0x163   :  { %v124_v18 = vmul.f32 %v123_v17, %v123_v17 }
 0x165   :  { %v125_v19 = vsel %vm117_vm2, %v124_v18, 0.0 }
 0x166   :  { %126 = vadd.xlane.f32.xlu0 %v125_v19 }
 0x1ef   :  { %v127_v24 = vpop.xlane.xlu0 %126 }
 0x1f0   :  { %v128_v25 = vmul.f32 0.03125, %v127_v24 }
 0x1f2   :  { %v129_v26 = vadd.f32 1e-05, %v128_v25 }
 0x1f4   :  { %305 = vrsqrt.f32 %v129_v26 }
 0x201   :  { %v306_v27 = vpop.eup %305 }
 0x202   :  { %v131_v29 = vmul.f32 %v306_v27, %v123_v17 }
 0x204   :  { %v139_v31 = vmul.f32 %v254_v28, %v131_v29 }
 0x206   :  { %v147_v32 = vadd.f32 %v255_v30, %v139_v31 }
 0x208   :  { %v149_v33 = vmul.f32 0.70710677, %v147_v32  ;;  %v148_v35 = vmul.f32 0.5, %v147_v32 }
 0x20a   :  { %307 = verf.f32 %v149_v33 }
 0x217   :  { %v308_v34 = vpop.eup %307 }
 0x218   :  { %v151_v36 = vadd.f32 1.0, %v308_v34 }
 0x21a   :  { %v152_v37 = vmul.f32 %v151_v36, %v148_v35 }
 0x21c   :  { %300 = vmatmul.mubr.msk.f32.vlgmr.msra.gmra.mxu1 %vm117_vm2, %v152_v37 }
 0x2dc   :  { %v233_v39 = vpop.f32.mrf.mxu1 }
 0x2dd   :  { %v234_v40 = vadd.f32 %v256_v38, %v233_v39 }
 0x2de   :  { %v301_v41 = vpop.f32.mrf.mxu1 }
 0x2df   :  { %237 = vst [vmem:[#allocation2] sm:$0xff] %v234_v40 }
 0x2e0   :  { %320 = shalt.err (!%p317_p4)
}
 0x2e1   :  { %247 = dma.vmem_to_hbm [thread:$0]  %s245_s8, 128, %s438_s7, [#allocation3]  }
 0x2e2   :  { %329 = dma.done.wait [#allocation3], 128  }
 0x2e3   :  { %330 = vsyncadd [#allocation3], 4294967168 }
 0x2e4   :  { %251 = vsyncpa [#allocation3], 1 }

</bundles_post_ra>
